<compile_context>
chip_gen: v7x
topology: tpu7x:2x2x1
jax: 0.10.0
libtpu: 0.0.40
codegen_flags: <defaults>
</compile_context>

<pallas_src>
import functools

import jax
import jax.numpy as jnp
from jax.experimental import pallas as pl
from jax.experimental.pallas import tpu as pltpu


def _cdiv(a, b):
    return -(-a // b)


def _round_up(x, m):
    return _cdiv(x, m) * m


def _sublane(itemsize):
    # Sublane padding granularity of a VMEM tile: f32 -> 8, bf16 -> 16, int8/fp8 -> 32.
    return 8 * (4 // itemsize)


def _vmem_tile_bytes(rows, cols, itemsize):
    """Bytes one (rows, cols) block occupies in VMEM after (sublane, 128-lane) padding."""
    return (_round_up(max(rows, 1), _sublane(itemsize))
            * _round_up(max(cols, 1), 128) * itemsize)


def _vmem_capacity_bytes():
    try:
        return int(pltpu.get_tpu_info().vmem_capacity_bytes)
    except Exception:
        return 64 << 20  # conservative fallback: v7x per-TensorCore VMEM


def _largest_k_tile(K, cap_elems):
    """Largest tk <= cap_elems with tk % 128 == 0 and K % tk == 0 (None if none exists)."""
    tk = (min(K, cap_elems) // 128) * 128
    while tk >= 128:
        if K % tk == 0:
            return tk
        tk -= 128
    return None


def _choose_tiles(N, K, C, x_itemsize, budget, nbuf, block_n_max, block_k):
    """Pick (tn, tk, vmem_bytes_needed) so the pipelined buffers fit in `budget` bytes."""
    split = x_itemsize == 4  # f32 inputs get an in-kernel bf16 hi/lo split (temporaries)

    def vmem_needed(tn_, tk_):
        x_tiles = nbuf * _vmem_tile_bytes(tn_, tk_, x_itemsize)      # pipelined x tiles
        split_tmp = 2 * _vmem_tile_bytes(tn_, tk_, 2) if split else 0  # bf16 hi/lo temps
        return (x_tiles + split_tmp
                + 2 * _vmem_tile_bytes(tk_, C, 2)                    # pipelined selector
                + 3 * _vmem_tile_bytes(tn_, C, 4)                    # out (x2) + f32 acc
                + _vmem_tile_bytes(1, C, 4))                         # bias (resident)

    # Batch tile: as large as possible (amortizes the ~0.35us per-grid-step overhead), a
    # multiple of 8, but capped at ceil(N/2) when N > 8 so the "parallel" batch axis has at
    # least two steps and can be sharded across both v7x TensorCores.
    tn = N if N <= 8 else min(block_n_max, _round_up(_cdiv(N, 2), 8))

    if block_k is not None:                      # explicit override (used by the tests)
        return tn, block_k, vmem_needed(tn, block_k)

    # 1) Prefer a single full-K block; shrink the batch tile (not below ~256 rows) to fit.
    while tn > 256 and vmem_needed(tn, K) > budget:
        tn = _round_up(tn // 2, 8)
    if vmem_needed(tn, K) <= budget:
        return tn, K, vmem_needed(tn, K)

    # 2) Large images: tile the reduction axis with a multiple-of-128 divisor of K instead
    #    of shrinking tn into per-step-overhead territory.
    fixed = 3 * _vmem_tile_bytes(tn, C, 4) + _vmem_tile_bytes(1, C, 4)
    per_k_col = (nbuf * _round_up(tn, _sublane(x_itemsize)) * x_itemsize
                 + (2 * _round_up(tn, 16) * 2 if split else 0)
                 + 2 * 128 * 2)
    tk = _largest_k_tile(K, max(128, (budget - fixed) // per_k_col))
    if tk is not None:
        return tn, tk, vmem_needed(tn, tk)

    # 3) K has no multiple-of-128 divisor (odd H*W*C): keep full-K blocks, shrink tn.
    # TODO(synk): an Element-indexed K window would avoid shrinking tn for this rare case.
    while tn > 8 and vmem_needed(tn, K) > budget:
        tn = max(8, _round_up(tn // 2, 8))
    return tn, K, vmem_needed(tn, K)


def _hnet_pooling_kernel(x_ref, s_ref, bias_ref, o_ref, acc_ref, *, inv_hw, split_f32):
    # x_ref: [TN, TK]; s_ref: [TK, C] bf16 0/1; bias_ref: [1, C] f32;
    # o_ref: [TN, C]; acc_ref: [TN, C] f32 scratch (resident across the K grid axis).
    k = pl.program_id(1)

    @pl.when(k == 0)
    def _init():
        acc_ref[...] = jnp.zeros_like(acc_ref)

    x = x_ref[...]
    s = s_ref[...]
    if split_f32:
        # Manual bf16x2: hi/lo split keeps f32-level accuracy for the mean while the MXU
        # runs 2 native single-pass bf16 matmuls (well under the HBM roofline on all gens).
        # The split is cheap VPU work hidden under the DMA; products against exact 0/1
        # selector entries are exact, accumulation is f32.
        x_hi = x.astype(jnp.bfloat16)
        x_lo = (x - x_hi.astype(jnp.float32)).astype(jnp.bfloat16)
        partial = (jnp.dot(x_hi, s, preferred_element_type=jnp.float32)
                   + jnp.dot(x_lo, s, preferred_element_type=jnp.float32))
    else:
        # bf16 inputs ride the MXU directly with f32 accumulation.
        partial = jnp.dot(x, s, preferred_element_type=jnp.float32)
    acc_ref[...] += partial

    @pl.when(k == pl.num_programs(1) - 1)
    def _finalize():
        # Mean scale + bias run once per output block (epilogue), not in the steady loop.
        o_ref[...] = (acc_ref[...] * inv_hw + bias_ref[...]).astype(o_ref.dtype)


def hnet_pooling_forward(x_nhwc, bias, *, block_n=2048, block_k=None, buffer_count=2):
    """HnetPooling forward: mean(x, dims=(H, W)) + bias.view(1, -1).

    x_nhwc: [N, H, W, C] float32 or bfloat16; bias: [C] with C == ncl.
    """
    N, H, W, C = x_nhwc.shape
    assert bias.shape == (C,), (bias.shape, C)
    assert jnp.dtype(x_nhwc.dtype) in (jnp.dtype(jnp.float32), jnp.dtype(jnp.bfloat16)), (
        x_nhwc.dtype)
    K = H * W * C
    inv_hw = 1.0 / float(H * W)
    x_itemsize = jnp.dtype(x_nhwc.dtype).itemsize

    x2d = x_nhwc.reshape(N, K)                        # lane-dense view; no data movement
    bias2d = bias.astype(jnp.float32).reshape(1, C)
    out_dtype = jnp.result_type(x_nhwc.dtype, bias.dtype)

    # Selector: S[k, c] = 1 iff k % C == c (row-major (H, W, C) flatten puts channel c at
    # k % C).  bf16 0/1 entries are exact; under jit this constant is folded/cached.
    sel = (jnp.arange(K, dtype=jnp.int32)[:, None] % C
           == jnp.arange(C, dtype=jnp.int32)[None, :])
    selector = sel.astype(jnp.bfloat16)

    if block_k is not None:
        assert block_k == K or (block_k % 128 == 0 and K % block_k == 0), (block_k, K)

    # ---- VMEM-aware tiling -----------------------------------------------------------
    vmem_cap = _vmem_capacity_bytes()
    budget = max(int(vmem_cap * 0.4), 8 << 20)    # ~26 MiB on v7x, ~52 MiB on v5e/v6e
    tn, tk, vmem_bytes_needed = _choose_tiles(
        N, K, C, x_itemsize, budget, max(2, buffer_count), block_n, block_k)
    nb, nk = _cdiv(N, tn), _cdiv(K, tk)

    vmem_limit = max(32 << 20, int(vmem_bytes_needed * 1.25) + (2 << 20))
    vmem_limit = int(min(vmem_limit,
                         max(vmem_cap - (2 << 20), vmem_bytes_needed + (2 << 20))))

    kernel = functools.partial(_hnet_pooling_kernel, inv_hw=inv_hw,
                               split_f32=(x_itemsize == 4))

    # x is the only stream worth deeper buffering; keep default double-buffering unless the
    # caller opts into more (pure streaming reduce -- the DMA is already fully overlapped).
    x_spec_kwargs = {}
    if buffer_count > 2:
        x_spec_kwargs = dict(pipeline_mode=pl.Buffered(buffer_count))

    out_itemsize = jnp.dtype(out_dtype).itemsize
    cost = pl.CostEstimate(
        flops=2 * N * K * C + 2 * N * C,
        transcendentals=0,
        bytes_accessed=(N * K * x_itemsize                              # x (dominant)
                        + (nb if nk > 1 else 1) * K * C * 2             # selector
                        + N * C * out_itemsize + C * 4))                # out + bias

    return pl.pallas_call(
        kernel,
        out_shape=jax.ShapeDtypeStruct((N, C), out_dtype),
        grid_spec=pltpu.PrefetchScalarGridSpec(
            num_scalar_prefetch=0,
            grid=(nb, nk),                                      # reduction axis innermost
            in_specs=[
                pl.BlockSpec((tn, tk), lambda i, k: (i, k), **x_spec_kwargs),  # x tile
                pl.BlockSpec((tk, C), lambda i, k: (k, 0)),                    # selector
                pl.BlockSpec((1, C), lambda i, k: (0, 0)),                     # bias
            ],
            out_specs=pl.BlockSpec((tn, C), lambda i, k: (i, 0)),  # resident across k
            scratch_shapes=[pltpu.VMEM((tn, C), jnp.float32)],     # f32 accumulator
        ),
        compiler_params=pltpu.CompilerParams(
            dimension_semantics=("parallel", "arbitrary"),         # megacore on batch axis
            vmem_limit_bytes=vmem_limit,
        ),
        cost_estimate=cost,
    )(x2d, selector, bias2d)


def _reference(x_nhwc, bias):
    # Pure-JAX reference of the PyTorch forward: mean over dims (1, 2) + bias.view(1, -1).
    xf = x_nhwc.astype(jnp.float32)
    return jnp.mean(xf, axis=(1, 2)) + bias.astype(jnp.float32).reshape(1, -1)


if __name__ == "__main__":
    key = jax.random.PRNGKey(0)
    k1, k2 = jax.random.split(key)

    NCL = 10                                              # module default ncl
    bias = jnp.full((NCL,), 0.01, dtype=jnp.float32)      # module init: ones(ncl) * 0.01

    # Case 1: small module-consistent shape; single-step grid, full-K block.
    N1, H1, W1 = 8, 8, 8
    x1 = jax.random.normal(k1, (N1, H1, W1, NCL), dtype=jnp.float32)
    out1 = jax.block_until_ready(hnet_pooling_forward(x1, bias))
    ref1 = _reference(x1, bias)
    assert out1.shape == (N1, NCL), out1.shape
    assert jnp.allclose(out1, ref1, atol=1e-5, rtol=1e-5), float(jnp.max(jnp.abs(out1 - ref1)))

    # Case 2: partial final batch block (N=12 with tn=8) plus a tiled reduction axis
    # (block_k=128 -> 5 K-steps) to exercise the accumulator init/finalize path.
    N2, H2, W2 = 12, 8, 8
    x2 = jax.random.normal(k2, (N2, H2, W2, NCL), dtype=jnp.float32)
    out2 = jax.block_until_ready(hnet_pooling_forward(x2, bias, block_k=128))
    ref2 = _reference(x2, bias)
    assert out2.shape == (N2, NCL), out2.shape
    assert jnp.allclose(out2, ref2, atol=1e-5, rtol=1e-5), float(jnp.max(jnp.abs(out2 - ref2)))

    print("KERNEL_OK")
</pallas_src>

<mosaic_0001>
module attributes {stable_mosaic.version = 11 : i64} {
  func.func @_hnet_pooling_kernel(%arg0: i32, %arg1: i32, %arg2: memref<8x640xf32, #tpu.memory_space<vmem>>, %arg3: memref<640x10xbf16, #tpu.memory_space<vmem>>, %arg4: memref<1x10xf32, #tpu.memory_space<vmem>>, %arg5: memref<8x10xf32, #tpu.memory_space<vmem>>, %arg6: memref<8x10xf32, #tpu.memory_space<vmem>>) attributes {dimension_semantics = [#tpu.dimension_semantics<parallel>, #tpu.dimension_semantics<arbitrary>], iteration_bounds = array<i64: 1, 1>, scalar_prefetch = 0 : i64, scratch_operands = 1 : i64, tpu.core_type = #tpu.core_type<tc>, window_params = [{transform_indices = @transform_0, window_bounds = array<i64: 8, 640>}, {transform_indices = @transform_1, window_bounds = array<i64: 640, 10>}, {pipeline_mode = #tpu.pipeline_mode<synchronous>, transform_indices = @transform_2, window_bounds = array<i64: 1, 10>}, {transform_indices = @transform_3, window_bounds = array<i64: 8, 10>}]} {
    %c0_i32 = arith.constant 0 : i32
    %0 = arith.cmpi eq, %arg1, %c0_i32 : i32
    %1 = arith.extui %0 : i1 to i32
    %c0_i32_0 = arith.constant 0 : i32
    %2 = arith.cmpi ne, %1, %c0_i32_0 : i32
    scf.if %2 {
      %cst_11 = arith.constant 0.000000e+00 : f32
      %18 = vector.broadcast %cst_11 : f32 to vector<8x10xf32>
      %c0_12 = arith.constant 0 : index
      %c0_13 = arith.constant 0 : index
      %19 = vector.load %arg6[%c0_12, %c0_13] : memref<8x10xf32, #tpu.memory_space<vmem>>, vector<8x10xf32>
      tpu.vector_store %arg6[%c0_12, %c0_13], %18 {strides = array<i32>} : memref<8x10xf32, #tpu.memory_space<vmem>>, vector<8x10xf32>,
    } else {
    }
    %c0 = arith.constant 0 : index
    %c0_1 = arith.constant 0 : index
    %3 = vector.load %arg2[%c0, %c0_1] : memref<8x640xf32, #tpu.memory_space<vmem>>, vector<8x640xf32>
    %c0_2 = arith.constant 0 : index
    %c0_3 = arith.constant 0 : index
    %4 = vector.load %arg3[%c0_2, %c0_3] : memref<640x10xbf16, #tpu.memory_space<vmem>>, vector<640x10xbf16>
    %5 = arith.truncf %3 : vector<8x640xf32> to vector<8x640xbf16>
    %6 = arith.extf %5 : vector<8x640xbf16> to vector<8x640xf32>
    %7 = arith.subf %3, %6 : vector<8x640xf32>
    %8 = arith.truncf %7 : vector<8x640xf32> to vector<8x640xbf16>
    %cst = arith.constant dense<0.000000e+00> : vector<8x10xf32>
    %9 = tpu.matmul %5, %4, %cst {dimension_numbers = #tpu.dot_dimension_numbers<[1], [0], [0], [1], [0, 0, 1, 1], [], []>} : vector<8x640xbf16>, vector<640x10xbf16>, vector<8x10xf32> -> vector<8x10xf32>
    %cst_4 = arith.constant dense<0.000000e+00> : vector<8x10xf32>
    %10 = tpu.matmul %8, %4, %cst_4 {dimension_numbers = #tpu.dot_dimension_numbers<[1], [0], [0], [1], [0, 0, 1, 1], [], []>} : vector<8x640xbf16>, vector<640x10xbf16>, vector<8x10xf32> -> vector<8x10xf32>
    %11 = arith.addf %9, %10 : vector<8x10xf32>
    %c0_5 = arith.constant 0 : index
    %c0_6 = arith.constant 0 : index
    %12 = vector.load %arg6[%c0_5, %c0_6] : memref<8x10xf32, #tpu.memory_space<vmem>>, vector<8x10xf32>
    %13 = arith.addf %12, %11 : vector<8x10xf32>
    %c0_7 = arith.constant 0 : index
    %c0_8 = arith.constant 0 : index
    %14 = vector.load %arg6[%c0_7, %c0_8] : memref<8x10xf32, #tpu.memory_space<vmem>>, vector<8x10xf32>
    tpu.vector_store %arg6[%c0_7, %c0_8], %13 {strides = array<i32>} : memref<8x10xf32, #tpu.memory_space<vmem>>, vector<8x10xf32>,
    %c0_i32_9 = arith.constant 0 : i32
    %15 = arith.cmpi eq, %arg1, %c0_i32_9 : i32
    %16 = arith.extui %15 : i1 to i32
    %c0_i32_10 = arith.constant 0 : i32
    %17 = arith.cmpi ne, %16, %c0_i32_10 : i32
    scf.if %17 {
      %c0_11 = arith.constant 0 : index
      %c0_12 = arith.constant 0 : index
      %18 = vector.load %arg6[%c0_11, %c0_12] : memref<8x10xf32, #tpu.memory_space<vmem>>, vector<8x10xf32>
      %cst_13 = arith.constant 1.562500e-02 : f32
      %19 = vector.broadcast %cst_13 : f32 to vector<8x10xf32>
      %20 = arith.mulf %18, %19 : vector<8x10xf32>
      %c0_14 = arith.constant 0 : index
      %c0_15 = arith.constant 0 : index
      %21 = vector.load %arg4[%c0_14, %c0_15] : memref<1x10xf32, #tpu.memory_space<vmem>>, vector<1x10xf32>
      %22 = vector.broadcast %21 : vector<1x10xf32> to vector<8x10xf32>
      %23 = arith.addf %20, %22 : vector<8x10xf32>
      %c0_16 = arith.constant 0 : index
      %c0_17 = arith.constant 0 : index
      %24 = vector.load %arg5[%c0_16, %c0_17] : memref<8x10xf32, #tpu.memory_space<vmem>>, vector<8x10xf32>
      tpu.vector_store %arg5[%c0_16, %c0_17], %23 {strides = array<i32>} : memref<8x10xf32, #tpu.memory_space<vmem>>, vector<8x10xf32>,
    } else {
    }
    return
  }
  func.func @transform_0(%arg0: i32, %arg1: i32) -> (i32, i32) {
    %c0_i32 = arith.constant 0 : i32
    return %arg0, %arg1 : i32, i32
  }
  func.func @transform_1(%arg0: i32, %arg1: i32) -> (i32, i32) {
    %c0_i32 = arith.constant 0 : i32
    %c0_i32_0 = arith.constant 0 : i32
    return %arg1, %c0_i32 : i32, i32
  }
  func.func @transform_2(%arg0: i32, %arg1: i32) -> (i32, i32) {
    %c0_i32 = arith.constant 0 : i32
    %c0_i32_0 = arith.constant 0 : i32
    %c0_i32_1 = arith.constant 0 : i32
    return %c0_i32, %c0_i32_0 : i32, i32
  }
  func.func @transform_3(%arg0: i32, %arg1: i32) -> (i32, i32) {
    %c0_i32 = arith.constant 0 : i32
    %c0_i32_0 = arith.constant 0 : i32
    return %arg0, %c0_i32 : i32, i32
  }
}

</mosaic_0001>

<bundles_post_ra>
// kernel: tpu_custom_call.1
= control target key start
LH: loop header
LB: loop body
LE: loop exit
PB: predicated region body
PF: predicated region fallthrough
CT: control target
= control target key end

     0   :  { %v893_v39 = vmov 0.0   ;;  %s1230_s0 = inlined_call_operand.vmem [shape: f32[8,640], index: 0, kind: input, shape index: {}]   ;;  %s1231_s1 = inlined_call_operand.vmem [shape: bf16[640,10], index: 1, kind: input, shape index: {}]   ;;  %s1232_s2 = inlined_call_operand.vmem [shape: f32[1,10], index: 2, kind: input, shape index: {}]   ;;  %s1233_s3 = inlined_call_operand.hbm [shape: f32[8,10], index: 3, kind: output, shape index: {}]  }
   0x1   :  { %v919_v0 = vld [vmem:[%s1231_s1 + $0x40] sm:$0xff]   ;;  %v942_v4 = vld [vmem:[%s1231_s1 + $0x48] sm:$0xff]   ;;  %v966_v8 = vld [vmem:[%s1231_s1 + $0x50] sm:$0xff]  }
   0x2   :  { %v924_v1 = vld [vmem:[%s1231_s1 + $0xc0] sm:$0xff]   ;;  %680 = vmatprep.subr.bf16.mxu0 %v919_v0  ;;  %v948_v5 = vld [vmem:[%s1231_s1 + $0xc8] sm:$0xff]   ;;  %v972_v9 = vld [vmem:[%s1231_s1 + $0xd0] sm:$0xff]  }
   0x3   :  { %v930_v2 = vld [vmem:[%s1231_s1] sm:$0xff]   ;;  %702 = vmatprep.subr.bf16.mxu1 %v924_v1  ;;  %v954_v6 = vld [vmem:[%s1231_s1 + $0x8] sm:$0xff]   ;;  %v978_v10 = vld [vmem:[%s1231_s1 + $0x10] sm:$0xff]  }
   0x4   :  { %v936_v3 = vld [vmem:[%s1231_s1 + $0x80] sm:$0xff]   ;;  %681 = vmatpush3.bf16.msra.mxu0 %v930_v2  ;;  %v960_v7 = vld [vmem:[%s1231_s1 + $0x88] sm:$0xff]   ;;  %v984_v11 = vld [vmem:[%s1231_s1 + $0x90] sm:$0xff]  }
   0x5   :  { %703 = vmatpush3.bf16.msra.mxu1 %v936_v3  ;;  %682 = vmatprep.subr.bf16.mxu0 %v942_v4  ;;  %v990_v12 = vld [vmem:[%s1231_s1 + $0x58] sm:$0xff]   ;;  %v1014_v16 = vld [vmem:[%s1231_s1 + $0x60] sm:$0xff]   ;;  %v1038_v20 = vld [vmem:[%s1231_s1 + $0x68] sm:$0xff]  }
   0x6   :  { %704 = vmatprep.subr.bf16.mxu1 %v948_v5  ;;  %v996_v13 = vld [vmem:[%s1231_s1 + $0xd8] sm:$0xff]   ;;  %v1020_v17 = vld [vmem:[%s1231_s1 + $0xe0] sm:$0xff]   ;;  %v1044_v21 = vld [vmem:[%s1231_s1 + $0xe8] sm:$0xff]  }
   0x7   :  { %v1002_v14 = vld [vmem:[%s1231_s1 + $0x18] sm:$0xff]   ;;  %v1026_v18 = vld [vmem:[%s1231_s1 + $0x20] sm:$0xff]   ;;  %v1050_v22 = vld [vmem:[%s1231_s1 + $0x28] sm:$0xff]  }
   0x8   :  { %683 = vmatpush3.bf16.msra.mxu0 %v954_v6  ;;  %v1008_v15 = vld [vmem:[%s1231_s1 + $0x98] sm:$0xff]   ;;  %v1032_v19 = vld [vmem:[%s1231_s1 + $0xa0] sm:$0xff]   ;;  %v1056_v23 = vld [vmem:[%s1231_s1 + $0xa8] sm:$0xff]  }
   0x9   :  { %705 = vmatpush3.bf16.msra.mxu1 %v960_v7  ;;  %684 = vmatprep.subr.bf16.mxu0 %v966_v8  ;;  %v1062_v24 = vld [vmem:[%s1231_s1 + $0x70] sm:$0xff]   ;;  %v1086_v28 = vld [vmem:[%s1231_s1 + $0x78] sm:$0xff]   ;;  %v23_v32 = vld [vmem:[%s1230_s0 + $0x8] sm:$0xff] }
   0xa   :  { %706 = vmatprep.subr.bf16.mxu1 %v972_v9  ;;  %v1068_v25 = vld [vmem:[%s1231_s1 + $0xf0] sm:$0xff]   ;;  %v1092_v29 = vld [vmem:[%s1231_s1 + $0xf8] sm:$0xff]   ;;  %v22_v34 = vld [vmem:[%s1230_s0] sm:$0xff]  ;;  %v108_v35 = vpack.c.bf16 %v23_v32, %v23_v32 }
   0xb   :  { %v1074_v26 = vld [vmem:[%s1231_s1 + $0x30] sm:$0xff]   ;;  %v1098_v30 = vld [vmem:[%s1231_s1 + $0x38] sm:$0xff]   ;;  %v1119_v37 = vpack.c.bf16 %v22_v34, %v22_v34  ;;  %v861_v52 = vld [vmem:[%s1231_s1 + $0x100] sm:$0xff]  }
   0xc   :  { %685 = vmatpush3.bf16.msra.mxu0 %v978_v10  ;;  %v1080_v27 = vld [vmem:[%s1231_s1 + $0xb0] sm:$0xff]   ;;  %v1104_v31 = vld [vmem:[%s1231_s1 + $0xb8] sm:$0xff]   ;;  %v113_v41 = vunpack.c.l.bf16 %v108_v35 }
   0xd   :  { %707 = vmatpush3.bf16.msra.mxu1 %v984_v11  ;;  %686 = vmatprep.subr.bf16.mxu0 %v990_v12  ;;  %v25_v33 = vld [vmem:[%s1230_s0 + $0x18] sm:$0xff]  ;;  %v24_v38 = vld [vmem:[%s1230_s0 + $0x10] sm:$0xff]  ;;  %v112_v43 = vunpack.c.l.bf16 %v1119_v37 }
   0xe   :  { %708 = vmatprep.subr.bf16.mxu1 %v996_v13  ;;  %v1117_v36 = vpack.c.bf16 %v25_v33, %v25_v33  ;;  %v1125_v40 = vpack.c.bf16 %v24_v38, %v24_v38  ;;  %v118_v45 = vsub.f32 %v23_v32, %v113_v41 }
   0xf   :  { %v117_v47 = vsub.f32 %v22_v34, %v112_v43 }
  0x10   :  { %687 = vmatpush3.bf16.msra.mxu0 %v1002_v14  ;;  %v115_v42 = vunpack.c.l.bf16 %v1117_v36  ;;  %v114_v44 = vunpack.c.l.bf16 %v1125_v40  ;;  %v123_v49 = vpack.c.bf16 %v118_v45, %v118_v45 }
  0x11   :  { %709 = vmatpush3.bf16.msra.mxu1 %v1008_v15  ;;  %688 = vmatprep.subr.bf16.mxu0 %v1014_v16  ;;  %v122_v51 = vpack.c.bf16 %v117_v47, %v117_v47 }
  0x12   :  { %710 = vmatprep.subr.bf16.mxu1 %v1020_v17  ;;  %v120_v46 = vsub.f32 %v25_v33, %v115_v42  ;;  %v119_v48 = vsub.f32 %v24_v38, %v114_v44  ;;  %399 = vmatprep.mubr.bf16.mxu0 %v123_v49 }
  0x14   :  { %689 = vmatpush3.bf16.msra.mxu0 %v1026_v18  ;;  %v125_v50 = vpack.c.bf16 %v120_v46, %v120_v46  ;;  %v124_v53 = vpack.c.bf16 %v119_v48, %v119_v48 }
  0x15   :  { %711 = vmatpush3.bf16.msra.mxu1 %v1032_v19  ;;  %690 = vmatprep.subr.bf16.mxu0 %v1038_v20 }
  0x16   :  { %712 = vmatprep.subr.bf16.mxu1 %v1044_v21  ;;  %439 = vmatprep.mubr.bf16.mxu1 %v125_v50 }
  0x18   :  { %691 = vmatpush3.bf16.msra.mxu0 %v1050_v22 }
  0x19   :  { %713 = vmatpush3.bf16.msra.mxu1 %v1056_v23  ;;  %692 = vmatprep.subr.bf16.mxu0 %v1062_v24 }
  0x1a   :  { %714 = vmatprep.subr.bf16.mxu1 %v1068_v25 }
  0x1c   :  { %693 = vmatpush3.bf16.msra.mxu0 %v1074_v26 }
  0x1d   :  { %715 = vmatpush3.bf16.msra.mxu1 %v1080_v27  ;;  %694 = vmatprep.subr.bf16.mxu0 %v1086_v28 }
  0x1e   :  { %716 = vmatprep.subr.bf16.mxu1 %v1092_v29 }
  0x20   :  { %695 = vmatpush3.bf16.msra.mxu0 %v1098_v30 }
  0x21   :  { %717 = vmatpush3.bf16.msra.mxu1 %v1104_v31  ;;  %786 = vmatprep.subr.bf16.mxu0 %v893_v39 }
  0x22   :  { %733 = vmatprep.subr.bf16.mxu1 %v919_v0 }
  0x23   :  { %8 = vsyncpa [#allocation4], 0  ;;  %400 = vmatmul.mubr.bf16.vlgmr.msra.gmra.mrb[0].mxu0 %v122_v51  ;;  %v862_v54 = vld [vmem:[%s1231_s1 + $0x108] sm:$0xff]   ;;  %vm894_vm0 = vmmov 0   ;;  %v863_v55 = vld [vmem:[%s1231_s1 + $0x110] sm:$0xff]   ;;  %vm20_vm1 = vcmask 80896  }
  0x24   :  { %440 = vmatmul.mubr.bf16.vlgmr.msra.gmra.mrb[0].mxu1 %v124_v53  ;;  %787 = vmatpush3.bf16.msra.mxu0 %v861_v52  ;;  %v864_v56 = vld [vmem:[%s1231_s1 + $0x118] sm:$0xff]   ;;  %v865_v57 = vld [vmem:[%s1231_s1 + $0x120] sm:$0xff]   ;;  %v866_v60 = vld [vmem:[%s1231_s1 + $0x128] sm:$0xff]   ;;  %21 = vst.msk [vmem:[#allocation2] sm:$0xff] %vm20_vm1, %v893_v39  ;;  %s895_s21 = smov [#allocation3]  }
  0x25   :  { %734 = vmatpush3.bf16.msra.mxu1 %v930_v2  ;;  %788 = vmatprep.subr.bf16.mxu0 %v893_v39  ;;  %v26_v58 = vld [vmem:[%s1230_s0 + $0x20] sm:$0xff]  ;;  %v867_v62 = vld [vmem:[%s1231_s1 + $0x130] sm:$0xff]   ;;  %v868_v0 = vld [vmem:[%s1231_s1 + $0x138] sm:$0xff]   ;;  %s631_s22 = sshll.u32 %s895_s21, 4  ;;  %s632_s22 = int_to_ptr.vmem [resolvable:$true] %s631_s22 }
  0x26   :  { %735 = vmatprep.subr.bf16.mxu1 %v942_v4  ;;  %802 = vmatprep.mubr.msk.bf16.mxu0 %vm894_vm0, %v893_v39  ;;  %v111_v59 = vpack.c.bf16 %v26_v58, %v26_v58  ;;  %v679_v38 = vld [vmem:[%s1232_s2] ss:$0 sm:$0xff]  ;;  %s869_s23 = scalar_lea.vmem %s632_s22, 128  ;;  %p874_p1 = scmp.lt.s32.totalorder %s632_s22, %s632_s22 }
  0x27   :  { %519 = vmatprep.mubr.bf16.mxu1 %v108_v35  ;;  %p870_p0 = scmp.ne.s32.totalorder %s632_s22, %s869_s23  ;;  %p875_p2 = scmp.lt.s32.totalorder %s869_s23, %s869_s23 }
  0x28   :  { %789 = vmatpush3.bf16.msra.mxu0 %v862_v54  ;;  %v116_v61 = vunpack.c.l.bf16 %v111_v59 }
  0x29   :  { %736 = vmatpush3.bf16.msra.mxu1 %v954_v6  ;;  %790 = vmatprep.subr.bf16.mxu0 %v893_v39  ;;  %p876_p3 = por %p875_p2, %p874_p1 }
  0x2a   :  { %737 = vmatprep.subr.bf16.mxu1 %v966_v8  ;;  %v121_v63 = vsub.f32 %v26_v58, %v116_v61 }
  0x2b   :  { %v607_v34 = vld [vmem:[#allocation2] sm:$0xff]  ;;  %p877_p4 = pnand %p876_p3, %p870_p0 }
  0x2c   :  { %791 = vmatpush3.bf16.msra.mxu0 %v863_v55  ;;  %v126_v2 = vpack.c.bf16 %v121_v63, %v121_v63 }
  0x2d   :  { %738 = vmatpush3.bf16.msra.mxu1 %v978_v10  ;;  %792 = vmatprep.subr.bf16.mxu0 %v893_v39 }
  0x2e   :  { %739 = vmatprep.subr.bf16.mxu1 %v990_v12 }
  0x30   :  { %793 = vmatpush3.bf16.msra.mxu0 %v864_v56 }
  0x31   :  { %740 = vmatpush3.bf16.msra.mxu1 %v1002_v14  ;;  %794 = vmatprep.subr.bf16.mxu0 %v893_v39 }
  0x32   :  { %741 = vmatprep.subr.bf16.mxu1 %v1014_v16 }
  0x34   :  { %795 = vmatpush3.bf16.msra.mxu0 %v865_v57 }
  0x35   :  { %742 = vmatpush3.bf16.msra.mxu1 %v1026_v18  ;;  %796 = vmatprep.subr.bf16.mxu0 %v893_v39 }
  0x36   :  { %743 = vmatprep.subr.bf16.mxu1 %v1038_v20 }
  0x38   :  { %797 = vmatpush3.bf16.msra.mxu0 %v866_v60 }
  0x39   :  { %744 = vmatpush3.bf16.msra.mxu1 %v1050_v22  ;;  %798 = vmatprep.subr.bf16.mxu0 %v893_v39 }
  0x3a   :  { %745 = vmatprep.subr.bf16.mxu1 %v1062_v24 }
  0x3c   :  { %799 = vmatpush3.bf16.msra.mxu0 %v867_v62 }
  0x3d   :  { %746 = vmatpush3.bf16.msra.mxu1 %v1074_v26  ;;  %800 = vmatprep.subr.bf16.mxu0 %v893_v39 }
  0x3e   :  { %747 = vmatprep.subr.bf16.mxu1 %v1086_v28 }
  0x40   :  { %801 = vmatpush3.bf16.msra.mxu0 %v868_v0 }
  0x41   :  { %748 = vmatpush3.bf16.msra.mxu1 %v1098_v30  ;;  %755 = vmatprep.subr.bf16.mxu0 %v924_v1 }
  0x42   :  { %806 = vmatprep.subr.bf16.mxu1 %v893_v39 }
  0x43   :  { %803 = vmatmul.mubr.bf16.vlgmr.msra.gmra.mrb[4].mxu0 %v126_v2 }
  0x44   :  { %520 = vmatmul.mubr.bf16.vlgmr.msra.gmra.mrb[4].mxu1 %v1119_v37  ;;  %756 = vmatpush3.bf16.msra.mxu0 %v936_v3 }
  0x45   :  { %807 = vmatpush3.bf16.msra.mxu1 %v861_v52  ;;  %757 = vmatprep.subr.bf16.mxu0 %v948_v5 }
  0x46   :  { %808 = vmatprep.subr.bf16.mxu1 %v893_v39  ;;  %559 = vmatprep.mubr.bf16.mxu0 %v1117_v36 }
  0x47   :  { %822 = vmatprep.mubr.msk.bf16.mxu1 %vm894_vm0, %v893_v39 }
  0x48   :  { %758 = vmatpush3.bf16.msra.mxu0 %v960_v7 }
  0x49   :  { %809 = vmatpush3.bf16.msra.mxu1 %v862_v54  ;;  %759 = vmatprep.subr.bf16.mxu0 %v972_v9 }
  0x4a   :  { %810 = vmatprep.subr.bf16.mxu1 %v893_v39 }
  0x4c   :  { %760 = vmatpush3.bf16.msra.mxu0 %v984_v11 }
  0x4d   :  { %811 = vmatpush3.bf16.msra.mxu1 %v863_v55  ;;  %761 = vmatprep.subr.bf16.mxu0 %v996_v13 }
  0x4e   :  { %812 = vmatprep.subr.bf16.mxu1 %v893_v39 }
  0x50   :  { %762 = vmatpush3.bf16.msra.mxu0 %v1008_v15 }
  0x51   :  { %813 = vmatpush3.bf16.msra.mxu1 %v864_v56  ;;  %763 = vmatprep.subr.bf16.mxu0 %v1020_v17 }
  0x52   :  { %814 = vmatprep.subr.bf16.mxu1 %v893_v39 }
  0x54   :  { %764 = vmatpush3.bf16.msra.mxu0 %v1032_v19 }
  0x55   :  { %815 = vmatpush3.bf16.msra.mxu1 %v865_v57  ;;  %765 = vmatprep.subr.bf16.mxu0 %v1044_v21 }
  0x56   :  { %816 = vmatprep.subr.bf16.mxu1 %v893_v39 }
  0x58   :  { %766 = vmatpush3.bf16.msra.mxu0 %v1056_v23 }
  0x59   :  { %817 = vmatpush3.bf16.msra.mxu1 %v866_v60  ;;  %767 = vmatprep.subr.bf16.mxu0 %v1068_v25 }
  0x5a   :  { %818 = vmatprep.subr.bf16.mxu1 %v893_v39 }
  0x5c   :  { %768 = vmatpush3.bf16.msra.mxu0 %v1080_v27 }
  0x5d   :  { %819 = vmatpush3.bf16.msra.mxu1 %v867_v62  ;;  %769 = vmatprep.subr.bf16.mxu0 %v1092_v29 }
  0x5e   :  { %820 = vmatprep.subr.bf16.mxu1 %v893_v39 }
  0x60   :  { %770 = vmatpush3.bf16.msra.mxu0 %v1104_v31 }
  0x61   :  { %821 = vmatpush3.bf16.msra.mxu1 %v868_v0 }
  0x63   :  { %560 = vmatmul.mubr.bf16.vlgmr.msra.gmra.mrb[8].mxu0 %v1125_v40 }
  0x64   :  { %823 = vmatmul.mubr.bf16.vlgmr.msra.gmra.mrb[8].mxu1 %v111_v59 }
  0xf6   :  { %v696_v1 = vpop.f32.mrb[0].mxu0 }
  0xf7   :  { %v718_v3 = vpop.f32.mrb[0].mxu1  ;;  %v697_v4 = vpop.f32.mrb[1].mxu0 }
  0xf8   :  { %v719_v5 = vpop.f32.mrb[1].mxu1  ;;  %v698_v6 = vadd.f32 %v697_v4, %v696_v1  ;;  %v699_v8 = vpop.f32.mrb[2].mxu0 }
  0xf9   :  { %v720_v7 = vadd.f32 %v719_v5, %v718_v3  ;;  %v721_v9 = vpop.f32.mrb[2].mxu1  ;;  %v700_v10 = vpop.f32.mrb[3].mxu0 }
  0xfa   :  { %v722_v11 = vpop.f32.mrb[3].mxu1 }
  0xfb   :  { %v442_v12 = vadd.f32 %v720_v7, %v698_v6 }
 0x116   :  { %v481_v13 = vpop.f32.mrb[4].mxu0 }
 0x117   :  { %v749_v14 = vpop.f32.mrb[4].mxu1  ;;  %v482_v15 = vadd.f32 %v481_v13, %v442_v12  ;;  %v804_v16 = vpop.f32.mrb[5].mxu0 }
 0x118   :  { %v750_v17 = vpop.f32.mrb[5].mxu1  ;;  %v484_v19 = vpop.f32.mrb[6].mxu0 }
 0x119   :  { %v751_v18 = vadd.f32 %v750_v17, %v749_v14  ;;  %v752_v20 = vpop.f32.mrb[6].mxu1  ;;  %v805_v21 = vpop.f32.mrb[7].mxu0 }
 0x11a   :  { %v753_v22 = vpop.f32.mrb[7].mxu1 }
 0x11b   :  { %v522_v23 = vadd.f32 %v751_v18, %v482_v15 }
 0x136   :  { %v771_v24 = vpop.f32.mrb[8].mxu0 }
 0x137   :  { %v601_v25 = vpop.f32.mrb[8].mxu1  ;;  %v772_v26 = vpop.f32.mrb[9].mxu0 }
 0x138   :  { %v824_v27 = vpop.f32.mrb[9].mxu1  ;;  %v773_v28 = vadd.f32 %v772_v26, %v771_v24  ;;  %v774_v29 = vpop.f32.mrb[10].mxu0 }
 0x139   :  { %v604_v30 = vpop.f32.mrb[10].mxu1  ;;  %v775_v31 = vpop.f32.mrb[11].mxu0 }
 0x13a   :  { %v825_v32 = vpop.f32.mrb[11].mxu1  ;;  %v562_v33 = vadd.f32 %v773_v28, %v522_v23 }
 0x13c   :  { %v602_v35 = vadd.f32 %v601_v25, %v562_v33 }
 0x13e   :  { %v608_v36 = vadd.f32 %v607_v34, %v602_v35 }
 0x140   :  { %610 = vst.msk [vmem:[#allocation2] sm:$0xff] %vm20_vm1, %v608_v36 }
 0x147   :  { %v614_v37 = vld [vmem:[#allocation2] sm:$0xff] }
 0x148   :  { %v615_v39 = vmul.f32 0.015625, %v614_v37 }
 0x14a   :  { %v623_v40 = vadd.f32 %v679_v38, %v615_v39 }
 0x14c   :  { %624 = vst.msk [vmem:[#allocation3] sm:$0xff] %vm20_vm1, %v623_v40 }
 0x14d   :  { %880 = shalt.err (!%p877_p4)
}
 0x14e   :  { %s881_s26 = scalar_lea.hbm %s1233_s3, 128 }
 0x14f   :  { %p882_p5 = scmp.ne.s32.totalorder %s1233_s3, %s881_s26  ;;  %p885_p6 = scmp.lt.u32.totalorder %s881_s26, %s1233_s3 }
 0x151   :  { %p887_p7 = pnand %p885_p6, %p882_p5 }
 0x153   :  { %890 = shalt.err (!%p887_p7)
}
 0x154   :  { %634 = dma.vmem_to_hbm [thread:$0]  %s632_s22, 128, %s1233_s3, [#allocation4]  }
 0x155   :  { %891 = dma.done.wait [#allocation4], 128  }
 0x156   :  { %892 = vsyncadd [#allocation4], 4294967168 }
 0x157   :  { %638 = vsyncpa [#allocation4], 1 }

</bundles_post_ra>
